<compile_context>
chip_gen: v6e
topology: v6e:2x2x1
jax: 0.10.0
libtpu: 0.0.40
codegen_flags: <defaults>
</compile_context>

<pallas_src>
import jax
import jax.numpy as jnp
from jax.experimental import pallas as pl
from jax.experimental.pallas import tpu as pltpu

LANE = 128      # lane width of a vreg
SUBLANE = 8     # f32 sublane count of a vreg

_VMEM_BUDGET = 32 * 1024 * 1024     # target double-buffered working set
_VMEM_HEADROOM = 8 * 1024 * 1024    # slack on top of the estimate


def _round_up(v, m):
    return (v + m - 1) // m * m


def _round_down(v, m):
    return (v // m) * m


def _sublane_packing(dtype):
    # Rows per packed vreg tile: 8 for 4-byte, 16 for 2-byte (bf16),
    # 32 for 1-byte (int8/fp8).
    return max(SUBLANE, (SUBLANE * 4) // jnp.dtype(dtype).itemsize)


def _default_num_slabs():
    # v7x has 2 TensorCores per chip; a leading "parallel" grid axis shards the
    # row range across them. On single-TC chips (v5e/v6e) splitting would just
    # serialize, so keep 1 there.
    try:
        kind = jax.devices()[0].device_kind.lower()
        if "v7" in kind:
            return 2
    except Exception:
        pass
    return 1


def _max_snippet_kernel(x_ref, w_ref, o_ref):
    """One grid step: fold a (tile_n, F) row tile into the running max.

    x_ref: (tile_n, F)        streamed tile of snippets (compute dtype)
    w_ref: (F, nf_pad)        weight, resident (constant index_map)
    o_ref: (8, nf_pad) f32    resident per-slab accumulator (8 sublane partials)
    Grid:  (num_slabs, steps_per_slab), semantics ("parallel", "arbitrary").
    """
    step = pl.program_id(1)

    @pl.when(step == 0)
    def _init():
        o_ref[...] = jnp.full(o_ref.shape, -jnp.inf, dtype=o_ref.dtype)

    # MXU matmul with f32 accumulation regardless of the streaming dtype.
    ls = jnp.dot(x_ref[...], w_ref[...], preferred_element_type=jnp.float32)

    # (tile_n, nf_pad) -> (tile_n//8, 8, nf_pad): reducing the leading axis is
    # elementwise maxima of (8, nf_pad) vreg slabs (VPU only). The single
    # cross-sublane reduce happens in the wrapper, not in the steady state.
    tn, nf = ls.shape
    part = jnp.max(ls.reshape(tn // SUBLANE, SUBLANE, nf), axis=0)
    o_ref[...] = jnp.maximum(o_ref[...], part)


def max_snippet_model(x, w, b, *, tile_n=32768, compute_dtype=jnp.bfloat16,
                      num_slabs=None):
    """x: (N, F), w: (F, num_fits), b: (num_fits,) -> (num_fits,) f32.

    tile_n:        snippet rows per grid step (clamped to the VMEM budget and
                   to N; rounded to the dtype's sublane packing).
    compute_dtype: streaming dtype for x / W (default bf16; f32 MXU accumulation
                   and f32 maxima either way). Use jnp.float32 for exact parity,
                   or e.g. jnp.float8_e4m3fn on v7x if accuracy allows.
    num_slabs:     leading "parallel" grid axis size (None = auto: 2 on v7x).
    """
    n, f = x.shape
    num_fits = w.shape[1]

    if compute_dtype is None:
        compute_dtype = x.dtype
    compute_dtype = jnp.dtype(compute_dtype)
    pack = _sublane_packing(compute_dtype)
    dsize = compute_dtype.itemsize

    x = x.astype(compute_dtype)
    w = w.astype(compute_dtype)

    # Lane-dense fits axis: pad to a 128-lane multiple (full-width post-matmul
    # path and unmasked accumulator stores); sliced back after the kernel.
    nf_pad = _round_up(num_fits, LANE)
    if nf_pad != num_fits:
        w = jnp.pad(w, ((0, 0), (0, nf_pad - num_fits)))

    # --- tile_n selection ---------------------------------------------------
    # Round to the dtype-dependent sublane packing, clamp to N, then clamp so
    # 2 x (lane-padded x tile) + 2 x W + accumulators fit the VMEM budget.
    tile_n = max(pack, _round_up(min(tile_n, _round_up(max(n, 1), pack)), pack))
    x_row_vmem = _round_up(f, LANE) * dsize                   # per row, lane-padded
    w_vmem = 2 * _round_up(f, pack) * nf_pad * dsize          # double-buffered W
    o_vmem = 2 * SUBLANE * nf_pad * 4                         # f32 accumulator block
    # TODO(synk): K-tile / separately stream W when num_features is large enough
    # that 2 x W crowds the VMEM budget (per review, for 10k+ feature counts).
    max_tile = _round_down(
        max(pack, (_VMEM_BUDGET - w_vmem - o_vmem) // (2 * x_row_vmem)), pack)
    tile_n = max(pack, min(tile_n, max_tile))

    # --- optional split across TensorCores (v7x) ----------------------------
    if num_slabs is None:
        num_slabs = _default_num_slabs()
    steps_total = pl.cdiv(n, tile_n)
    if num_slabs < 2 or steps_total < 2 * num_slabs:
        num_slabs = 1
    steps_per_slab = pl.cdiv(steps_total, num_slabs)

    # Pad the snippet axis by replicating the last valid row: replicated rows
    # are idempotent under max, so no per-step row masking is needed.
    n_pad = num_slabs * steps_per_slab * tile_n
    if n_pad != n:
        x = jnp.pad(x, ((0, n_pad - n), (0, 0)), mode="edge")

    grid = (num_slabs, steps_per_slab)
    vmem_est = 2 * tile_n * x_row_vmem + w_vmem + num_slabs * o_vmem
    cost = pl.CostEstimate(
        flops=2 * n_pad * f * nf_pad,
        transcendentals=0,
        bytes_accessed=int(x.size * dsize + w.size * dsize
                           + num_slabs * SUBLANE * nf_pad * 4),
    )

    out = pl.pallas_call(
        _max_snippet_kernel,
        out_shape=jax.ShapeDtypeStruct((num_slabs * SUBLANE, nf_pad), jnp.float32),
        grid=grid,
        in_specs=[
            # stream x tiles (double-buffered DMA overlaps the matmul)
            pl.BlockSpec((tile_n, f), lambda p, i: (p * steps_per_slab + i, 0)),
            # weight resident across the whole grid
            pl.BlockSpec((f, nf_pad), lambda p, i: (0, 0)),
        ],
        out_specs=pl.BlockSpec((SUBLANE, nf_pad), lambda p, i: (p, 0)),
        compiler_params=pltpu.CompilerParams(
            dimension_semantics=("parallel", "arbitrary"),
            vmem_limit_bytes=int(vmem_est + _VMEM_HEADROOM),
        ),
        cost_estimate=cost,
    )(x, w)

    # Single cross-sublane (and cross-slab) reduce, bias add (hoisted out of
    # the reduction; equal to per-row bias-before-max up to f32 rounding), and
    # removal of the lane padding.
    return jnp.max(out, axis=0)[:num_fits] + b


def init_params(key, num_features, num_fits):
    """Deterministic synthetic init mirroring init_weights() shapes:
    cat([ sqrt(0.5)*rand(F-1, num_fits)/sqrt(F-1), sqrt(0.5)*rand(1, num_fits) ], 0)
    -> weight of shape (num_features, num_fits) (already x@W layout), plus bias."""
    k1, k2, k3 = jax.random.split(key, 3)
    w_top = (0.5 ** 0.5) * jax.random.uniform(k1, (num_features - 1, num_fits)) \
        / (num_features - 1.0) ** 0.5
    w_bot = (0.5 ** 0.5) * jax.random.uniform(k2, (1, num_fits))
    w = jnp.concatenate([w_top, w_bot], axis=0).astype(jnp.float32)
    # nn.Linear also has a bias; initialize it deterministically too.
    bound = 1.0 / (num_features ** 0.5)
    b = jax.random.uniform(k3, (num_fits,), minval=-bound, maxval=bound).astype(jnp.float32)
    return w, b


if __name__ == "__main__":
    N = 200            # number of snippets (rows of x, reduced by max)
    num_features = 32
    num_fits = 16

    key = jax.random.PRNGKey(0)
    kx, kp = jax.random.split(key)
    x = jax.random.normal(kx, (N, num_features), dtype=jnp.float32)
    w, b = init_params(kp, num_features, num_fits)

    # Reference in plain JAX.
    ref = jnp.max(x @ w + b, axis=0)

    # Exact f32 path with multiple grid steps (partial last tile handled by
    # edge-row replication in the wrapper).
    out_f32 = jax.block_until_ready(
        max_snippet_model(x, w, b, tile_n=64, compute_dtype=jnp.float32))
    assert out_f32.shape == (num_fits,)
    assert jnp.allclose(out_f32, ref, atol=1e-5, rtol=1e-5)

    # Default path: bf16 streaming of x / W (f32 MXU accumulation, f32 maxima).
    out_bf16 = jax.block_until_ready(max_snippet_model(x, w, b))
    assert out_bf16.shape == (num_fits,)
    assert jnp.allclose(out_bf16, ref, atol=3e-2, rtol=3e-2)

    # Exercise the 2-slab "parallel" path (auto-enabled on v7x; forced here —
    # still correct on 1-TC chips, just serialized).
    out_split = jax.block_until_ready(
        max_snippet_model(x, w, b, tile_n=32, compute_dtype=jnp.float32,
                          num_slabs=2))
    assert jnp.allclose(out_split, ref, atol=1e-5, rtol=1e-5)

    print("KERNEL_OK")
</pallas_src>

<mosaic_0001>
module attributes {stable_mosaic.version = 11 : i64} {
  func.func @_max_snippet_kernel(%arg0: i32, %arg1: i32, %arg2: memref<64x32xf32, #tpu.memory_space<vmem>>, %arg3: memref<32x128xf32, #tpu.memory_space<vmem>>, %arg4: memref<8x128xf32, #tpu.memory_space<vmem>>) attributes {dimension_semantics = [#tpu.dimension_semantics<parallel>, #tpu.dimension_semantics<arbitrary>], iteration_bounds = array<i64: 1, 4>, scalar_prefetch = 0 : i64, scratch_operands = 0 : i64, tpu.core_type = #tpu.core_type<tc>, window_params = [{transform_indices = @transform_0, window_bounds = array<i64: 64, 32>}, {pipeline_mode = #tpu.pipeline_mode<synchronous>, transform_indices = @transform_1, window_bounds = array<i64: 32, 128>}, {transform_indices = @transform_2, window_bounds = array<i64: 8, 128>}]} {
    %c0_i32 = arith.constant 0 : i32
    %0 = arith.cmpi eq, %arg1, %c0_i32 : i32
    %1 = arith.extui %0 : i1 to i32
    %c0_i32_0 = arith.constant 0 : i32
    %2 = arith.cmpi ne, %1, %c0_i32_0 : i32
    scf.if %2 {
      %cst_9 = arith.constant 0xFF800000 : f32
      %11 = vector.broadcast %cst_9 : f32 to vector<8x128xf32>
      %c0_10 = arith.constant 0 : index
      %c0_11 = arith.constant 0 : index
      %12 = vector.load %arg4[%c0_10, %c0_11] : memref<8x128xf32, #tpu.memory_space<vmem>>, vector<8x128xf32>
      tpu.vector_store %arg4[%c0_10, %c0_11], %11 {strides = array<i32>} : memref<8x128xf32, #tpu.memory_space<vmem>>, vector<8x128xf32>,
    } else {
    }
    %c0 = arith.constant 0 : index
    %c0_1 = arith.constant 0 : index
    %3 = vector.load %arg2[%c0, %c0_1] : memref<64x32xf32, #tpu.memory_space<vmem>>, vector<64x32xf32>
    %c0_2 = arith.constant 0 : index
    %c0_3 = arith.constant 0 : index
    %4 = vector.load %arg3[%c0_2, %c0_3] : memref<32x128xf32, #tpu.memory_space<vmem>>, vector<32x128xf32>
    %cst = arith.constant dense<0.000000e+00> : vector<64x128xf32>
    %5 = tpu.matmul %3, %4, %cst {dimension_numbers = #tpu.dot_dimension_numbers<[1], [0], [0], [1], [0, 0, 1, 1], [], []>} : vector<64x32xf32>, vector<32x128xf32>, vector<64x128xf32> -> vector<64x128xf32>
    %6 = vector.shape_cast %5 : vector<64x128xf32> to vector<8x8x128xf32>
    %cst_4 = arith.constant dense<0xFF800000> : vector<8x128xf32>
    %7 = vector.multi_reduction <maximumf>, %6, %cst_4 [0] : vector<8x8x128xf32> to vector<8x128xf32>
    %c0_5 = arith.constant 0 : index
    %c0_6 = arith.constant 0 : index
    %8 = vector.load %arg4[%c0_5, %c0_6] : memref<8x128xf32, #tpu.memory_space<vmem>>, vector<8x128xf32>
    %9 = arith.maximumf %8, %7 : vector<8x128xf32>
    %c0_7 = arith.constant 0 : index
    %c0_8 = arith.constant 0 : index
    %10 = vector.load %arg4[%c0_7, %c0_8] : memref<8x128xf32, #tpu.memory_space<vmem>>, vector<8x128xf32>
    tpu.vector_store %arg4[%c0_7, %c0_8], %9 {strides = array<i32>} : memref<8x128xf32, #tpu.memory_space<vmem>>, vector<8x128xf32>,
    return
  }
  func.func @transform_0(%arg0: i32, %arg1: i32) -> (i32, i32) {
    %c4_i32 = arith.constant 4 : i32
    %0 = arith.muli %arg0, %c4_i32 : i32
    %1 = arith.addi %0, %arg1 : i32
    %c0_i32 = arith.constant 0 : i32
    %c0_i32_0 = arith.constant 0 : i32
    return %1, %c0_i32 : i32, i32
  }
  func.func @transform_1(%arg0: i32, %arg1: i32) -> (i32, i32) {
    %c0_i32 = arith.constant 0 : i32
    %c0_i32_0 = arith.constant 0 : i32
    %c0_i32_1 = arith.constant 0 : i32
    return %c0_i32, %c0_i32_0 : i32, i32
  }
  func.func @transform_2(%arg0: i32, %arg1: i32) -> (i32, i32) {
    %c0_i32 = arith.constant 0 : i32
    %c0_i32_0 = arith.constant 0 : i32
    return %arg0, %c0_i32 : i32, i32
  }
}

</mosaic_0001>

<bundles_post_ra>
// kernel: tpu_custom_call.1
= control target key start
LH: loop header
LB: loop body
LE: loop exit
PB: predicated region body
PF: predicated region fallthrough
CT: control target
= control target key end

     0   :  { %7 = vsyncpa [#allocation3], 0  ;;  %s539_s9 = smov 0   ;;  %s541_s10 = smov 0   ;;  %s617_s0 = inlined_call_operand.vmem [shape: f32[256,32], index: 0, kind: input, shape index: {}]   ;;  %s618_s1 = inlined_call_operand.vmem [shape: f32[32,128], index: 1, kind: input, shape index: {}]   ;;  %s619_s2 = inlined_call_operand.hbm [shape: f32[8,128], index: 2, kind: output, shape index: {}]  }
   0x1   :  { %s543_s11 = smov 0  }
   0x2 LB: > { %s379_s12 = sadd.s32 4294967295, %s520_s11   ;;  %s22_s13 = sadd.s32 1, %s516_s10  ;;  %s520_s11 = sphi %s543_s11, %s13_s11   ;;  %s516_s10 = sphi %s541_s10, %s622_s10   ;;  %s512_s9 = sphi %s539_s9, %s621_s9  }
   0x3   : > { %p23_p0 = scmp.ge.s32.totalorder %s22_s13, 4  ;;  %p382_p1 = scmp.ge.s32.totalorder %s520_s11, 1 }
   0x4   : > { %p134_p2 = scmp.lt.s32.totalorder %s520_s11, 5 }
   0x5   : > { %s624_s13 = smov (%p23_p0, %s22_s13), 0 }
   0x6   : > { %p135_p3 = pnand %p382_p1, %p134_p2 }
   0x7   : > { %s383_s14 = sshll.u32 (!%p135_p3), %s512_s9, 3  ;;  %p385_p5 = scmp.ne.s32.totalorder (!%p135_p3), %s512_s9, 0 }
   0x8   : > { %138 = sbr.rel (%p135_p3) target bundleno = 242 (0xf2), region = 28  ;;  %p156_p4 = scmp.lt.s32.totalorder (!%p135_p3), %s383_s14, 31 }
   0xd   : > { %s626_s14 = smov (!%p156_p4, %s383_s14), 31  ;;  %166 = sbr.rel (%p385_p5) target bundleno = 20 (0x14), region = 32 }
   0xe   : > { %s384_s15 = sshll.u32 %s626_s14, 3 }
   0xf   : > { %s561_s18 = scalar_lea.vmem %s617_s0, %s384_s15 }
  0x12   : > { %v522_v0 = vmov -inf  }
  0x13   : > { %167 = vst [vmem:[#allocation2] sm:$0xff] %v522_v0 }
  0x14 PF: > { %v179_v1 = vld [vmem:[%s618_s1 + $0x18] sm:$0xff]  ;;  %v178_v2 = vld [vmem:[%s618_s1 + $0x10] sm:$0xff]  ;;  %v177_v3 = vld [vmem:[%s618_s1 + $0x8] sm:$0xff]  ;;  %vm180_vm0 = vcmask 261120   ;;  %s523_s27 = smov [#allocation2]   ;;  %p593_p6 = scmp.eq.s32.totalorder %s379_s12, 3 }
  0x15   : > { %410 = vmatprep.subr.mxu0 %v179_v1  ;;  %430 = vmatprep.subr.mxu1 %v179_v1  ;;  %v176_v4 = vld [vmem:[%s618_s1] sm:$0xff]  ;;  %v169_v7 = vld [vmem:[%s561_s18 + $0x8] sm:$0xff]  ;;  %v170_v9 = vld [vmem:[%s561_s18 + $0x10] sm:$0xff]  ;;  %s329_s28 = sshll.u32 %s523_s27, 4  ;;  %s330_s28 = int_to_ptr.vmem [resolvable:$true] %s329_s28 }
  0x16   : > { %411 = vmatpush3.msra.mxu0 %v179_v1  ;;  %434 = vmatpush3.msra.mxu1 %v179_v1  ;;  %v168_v5 = vld [vmem:[%s561_s18] sm:$0xff]  ;;  %v173_v8 = vld [vmem:[%s561_s18 + $0x28] sm:$0xff]  ;;  %v174_v10 = vld [vmem:[%s561_s18 + $0x30] sm:$0xff]  ;;  %s470_s30 = scalar_lea.vmem %s330_s28, 128  ;;  %p477_p10 = scmp.lt.s32.totalorder %s330_s28, %s330_s28 }
  0x17   : > { %412 = vmatprep.subr.mxu0 %v178_v2  ;;  %431 = vmatprep.subr.mxu1 %v178_v2  ;;  %v172_v6 = vld [vmem:[%s561_s18 + $0x20] sm:$0xff]  ;;  %v171_v11 = vld [vmem:[%s561_s18 + $0x18] sm:$0xff]  ;;  %p471_p7 = scmp.ne.s32.totalorder %s330_s28, %s470_s30  ;;  %p478_p11 = scmp.lt.s32.totalorder %s470_s30, %s470_s30 }
  0x18   : > { %413 = vmatpush3.msra.mxu0 %v178_v2  ;;  %435 = vmatpush3.msra.mxu1 %v178_v2  ;;  %v175_v12 = vld [vmem:[%s561_s18 + $0x38] sm:$0xff] }
  0x19   : > { %414 = vmatprep.subr.mxu0 %v177_v3  ;;  %432 = vmatprep.subr.mxu1 %v177_v3  ;;  %p472_p8 = pnand %p471_p7, %p593_p6  ;;  %p479_p12 = por %p478_p11, %p477_p10 }
  0x1a   : > { %415 = vmatpush3.msra.mxu0 %v177_v3  ;;  %436 = vmatpush3.msra.mxu1 %v177_v3  ;;  %v317_v27 = vld [vmem:[#allocation2] sm:$0xff] }
  0x1b   : > { %416 = vmatprep.subr.mxu0 %v176_v4  ;;  %433 = vmatprep.subr.mxu1 %v176_v4  ;;  %p473_p9 = pneg %p472_p8 }
  0x1c   : > { %417 = vmatpush3.msra.mxu0 %v176_v4  ;;  %437 = vmatpush3.msra.mxu1 %v176_v4 }
  0x1d   : > { %418 = vmatprep.mubr.msk.f32.mxu0 %vm180_vm0, %v168_v5  ;;  %424 = vmatprep.mubr.msk.f32.mxu1 %vm180_vm0, %v172_v6  ;;  %p480_p13 = pnand %p479_p12, %p473_p9 }
  0x1e   : > { %419 = vmatmul.mubr.msk.f32.vlgmr.msra.gmra.mxu0 %vm180_vm0, %v169_v7  ;;  %425 = vmatmul.mubr.msk.f32.vlgmr.msra.gmra.mxu1 %vm180_vm0, %v173_v8 }
  0x1f   : > { %421 = vmatprep.mubr.msk.f32.mxu0 %vm180_vm0, %v170_v9  ;;  %427 = vmatprep.mubr.msk.f32.mxu1 %vm180_vm0, %v174_v10 }
  0x22   : > { %422 = vmatmul.mubr.msk.f32.gmra.mxu0 %vm180_vm0, %v171_v11  ;;  %428 = vmatmul.mubr.msk.f32.gmra.mxu1 %vm180_vm0, %v175_v12 }
  0xde   : > { %v420_v13 = vpop.f32.mrf.mxu0  ;;  %v426_v14 = vpop.f32.mrf.mxu1 }
  0xdf   : > { %v311_v22 = vmax.f32 %v420_v13, %v426_v14 }
  0xe0   : > { %v271_v15 = vpop.f32.mrf.mxu0  ;;  %v291_v16 = vpop.f32.mrf.mxu1 }
  0xe1   : > { %v310_v19 = vmax.f32 %v271_v15, %v291_v16 }
  0xe2   : > { %v423_v17 = vpop.f32.mrf.mxu0  ;;  %v429_v18 = vpop.f32.mrf.mxu1 }
  0xe3   : > { %v313_v23 = vmax.f32 %v423_v17, %v429_v18  ;;  %v314_v25 = vmax.f32 %v310_v19, %v311_v22 }
  0xe4   : > { %v281_v20 = vpop.f32.mrf.mxu0  ;;  %v301_v21 = vpop.f32.mrf.mxu1 }
  0xe5   : > { %v312_v24 = vmax.f32 %v281_v20, %v301_v21 }
  0xe7   : > { %v315_v26 = vmax.f32 %v312_v24, %v313_v23 }
  0xe9   : > { %v316_v28 = vmax.f32 %v314_v25, %v315_v26 }
  0xeb   : > { %v318_v29 = vmax.f32 %v317_v27, %v316_v28 }
  0xed   : > { %319 = vst [vmem:[#allocation2] sm:$0xff] %v318_v29 }
  0xee   : > { %483 = shalt.err (!%p480_p13)
}
  0xef   : > { %439 = dma.vmem_to_hbm [thread:$0]  (%p593_p6), %s330_s28, 128, %s619_s2, [#allocation3]  }
  0xf0   : > { %507 = dma.done.wait (%p593_p6), [#allocation3], 128  }
  0xf1   : > { %509 = vsyncadd (%p593_p6), [#allocation3], 4294967168 }
  0xf2 PF: > { %s13_s11 = sadd.s32 1, %s520_s11   ;;  %s621_s9 = smov %s516_s10 }
  0xf3   : > { %p10_p0 = scmp.ge.s32.totalorder %s13_s11, 6   ;;  %s622_s10 = smov %s624_s13 }
  0xf5   :  { %12 = sbr.rel (!%p10_p0) target bundleno = 2 (0x2), region = 60 }
  0xfa   :  { %342 = vsyncpa [#allocation3], 1 }
  0xfb   :  { %344 = vsyncpa [#allocation3 + $0x1], 1 }

</bundles_post_ra>
